<compile_context>
chip_gen: v7x
topology: tpu7x:2x2x1
jax: 0.10.0
libtpu: 0.0.40
codegen_flags: <defaults>
</compile_context>

<pallas_src>
import functools

import jax
import jax.numpy as jnp
from jax import lax
from jax.experimental import pallas as pl
from jax.experimental.pallas import tpu as pltpu


def mhsa_kernel(x_ref, wq_ref, wk_ref, wv_ref, bq_ref, bk_ref, bv_ref,
                wp_ref, bp_ref, o_ref, acc_ref, *, scale):
    # x_ref: (1, N, D); wq/wk/wv: (H, D, hd) bf16; bq/bk/bv: (H, 1, hd) f32;
    # wp: (H, hd, D) bf16; bp: (1, D) f32; o_ref: (1, N, D); acc_ref: (N, D) f32.
    num_heads = wq_ref.shape[0]
    n_tokens = x_ref.shape[1]
    embed_dims = x_ref.shape[2]

    x = x_ref[0].astype(jnp.bfloat16)                              # (N, D)

    # Seed the accumulator with the projection bias (saves an epilogue add).
    acc_ref[...] = jnp.broadcast_to(bp_ref[...], (n_tokens, embed_dims))

    # Rolled loop over heads: bounded live ranges / VMEM, dynamic first-axis
    # ref indexing for the per-head weight slabs.
    @pl.loop(0, num_heads)
    def _(h):
        wq = wq_ref[h]                                             # (D, hd) bf16
        wk = wk_ref[h]
        wv = wv_ref[h]

        q = jnp.dot(x, wq, preferred_element_type=jnp.float32) + bq_ref[h]
        k = jnp.dot(x, wk, preferred_element_type=jnp.float32) + bk_ref[h]
        v = jnp.dot(x, wv, preferred_element_type=jnp.float32) + bv_ref[h]

        # Fold the 1/sqrt(hd) scale into q (touches N*hd elems, not N*N).
        q = (q * scale).astype(jnp.bfloat16)
        k = k.astype(jnp.bfloat16)
        v = v.astype(jnp.bfloat16)

        # Scores: contract the head dim of q and k (q @ k^T) on the MXU.
        s = lax.dot_general(q, k, (((1,), (1,)), ((), ())),
                            preferred_element_type=jnp.float32)    # (N, N)
        # Numerically stable softmax; reciprocal goes to the EUP.
        s = s - jnp.max(s, axis=-1, keepdims=True)
        p = jnp.exp(s)
        denom = jnp.sum(p, axis=-1, keepdims=True)
        p = (p * pl.reciprocal(denom, approx=True)).astype(jnp.bfloat16)

        pv = jnp.dot(p, v, preferred_element_type=jnp.float32)     # (N, hd)

        # Fused per-head slice of the output projection, accumulated over h
        # (replaces the concatenate + full (D, D) projection).
        acc_ref[...] += jnp.dot(pv.astype(jnp.bfloat16), wp_ref[h],
                                preferred_element_type=jnp.float32)  # (N, D)

    o_ref[0] = acc_ref[...].astype(o_ref.dtype)


def multi_head_self_attention(x, w_qkv, b_qkv, w_proj, b_proj, *, num_heads):
    B, N, D = x.shape
    H = num_heads
    hd = D // H
    scale = 1.0 / float(hd) ** 0.5

    # ---- wrapper-side layout plumbing (plain XLA, free) -------------------
    # qkv Linear column order matches torch's reshape(B, N, 3, H, hd):
    # col = which * D + h * hd + e.
    w4 = w_qkv.reshape(D, 3, H, hd)
    wq = jnp.transpose(w4[:, 0], (1, 0, 2)).astype(jnp.bfloat16)   # (H, D, hd)
    wk = jnp.transpose(w4[:, 1], (1, 0, 2)).astype(jnp.bfloat16)
    wv = jnp.transpose(w4[:, 2], (1, 0, 2)).astype(jnp.bfloat16)
    b3 = b_qkv.reshape(3, H, 1, hd).astype(jnp.float32)
    bq, bk, bv = b3[0], b3[1], b3[2]                               # (H, 1, hd)
    wp = w_proj.reshape(H, hd, D).astype(jnp.bfloat16)             # (H, hd, D)
    bp = b_proj.reshape(1, D).astype(jnp.float32)                  # (1, D)

    kernel = functools.partial(mhsa_kernel, scale=scale)

    # ---- VMEM budget -------------------------------------------------------
    f32b, bf16b = 4, 2
    itemsize = jnp.dtype(x.dtype).itemsize
    weight_bytes = ((3 * H * D * hd + H * hd * D) * bf16b
                    + (3 * H * hd + D) * f32b)
    io_bytes = 2 * 2 * N * D * itemsize                  # x / out, double-buffered
    per_head_bytes = (3 * N * hd * (f32b + bf16b)        # q, k, v (+ bf16 copies)
                      + N * N * (2 * f32b + bf16b)       # scores, exp, bf16 p
                      + N * hd * (f32b + bf16b)          # p @ v
                      + N * D * f32b)                     # per-head proj slab
    resident_bytes = N * D * (f32b + bf16b)              # accumulator + bf16 x
    est = 2 * weight_bytes + io_bytes + per_head_bytes + resident_bytes
    vmem_limit = int(min(64 * 2 ** 20, max(32 * 2 ** 20, int(1.5 * est))))

    def build(single_buffer_weights):
        def wspec(shape):
            idx = lambda b, _n=len(shape): (0,) * _n
            if single_buffer_weights:
                # Grid-invariant operands: double-buffering them is pure waste.
                return pl.BlockSpec(shape, idx, pipeline_mode=pl.Buffered(1))
            return pl.BlockSpec(shape, idx)

        return pl.pallas_call(
            kernel,
            out_shape=jax.ShapeDtypeStruct((B, N, D), x.dtype),
            grid_spec=pltpu.PrefetchScalarGridSpec(
                num_scalar_prefetch=0,
                grid=(B,),
                in_specs=[
                    pl.BlockSpec((1, N, D), lambda b: (b, 0, 0)),   # x
                    wspec((H, D, hd)),                              # Wq
                    wspec((H, D, hd)),                              # Wk
                    wspec((H, D, hd)),                              # Wv
                    wspec((H, 1, hd)),                              # bq
                    wspec((H, 1, hd)),                              # bk
                    wspec((H, 1, hd)),                              # bv
                    wspec((H, hd, D)),                              # Wproj
                    wspec((1, D)),                                  # bproj
                ],
                out_specs=pl.BlockSpec((1, N, D), lambda b: (b, 0, 0)),
                scratch_shapes=[pltpu.VMEM((N, D), jnp.float32)],
            ),
            compiler_params=pltpu.CompilerParams(
                dimension_semantics=("parallel",),
                vmem_limit_bytes=vmem_limit),
        )

    args = (x, wq, wk, wv, bq, bk, bv, wp, bp)
    try:
        return build(True)(*args)
    except Exception:
        # Fallback: default double-buffered weights if this JAX version
        # rejects Buffered(1) single-buffering.
        return build(False)(*args)


def reference_mhsa(x, w_qkv, b_qkv, w_proj, b_proj, *, num_heads):
    """Pure-JAX f32 reference mirroring the PyTorch forward exactly."""
    B, N, D = x.shape
    hd = D // num_heads
    scale = 1.0 / (hd ** 0.5)
    qkv = x @ w_qkv + b_qkv[0]                         # (B, N, 3D)
    qkv = qkv.reshape(B, N, 3, num_heads, hd)
    qkv = jnp.transpose(qkv, (2, 0, 3, 1, 4))          # (3, B, H, N, hd)
    q, k, v = qkv[0], qkv[1], qkv[2]
    s = jnp.einsum('bhqd,bhkd->bhqk', q, k) * scale
    p = jax.nn.softmax(s, axis=-1)
    wv = jnp.einsum('bhqk,bhkd->bhqd', p, v)           # (B, H, N, hd)
    wv = jnp.transpose(wv, (0, 2, 1, 3)).reshape(B, N, D)
    return wv @ w_proj + b_proj[0]


if __name__ == "__main__":
    # Small shapes consistent with the module's forward:
    # batch=2, num_tokens=8, embed_dims=32, num_heads=4 (head_dim=8).
    B, N, D, H = 2, 8, 32, 4

    key = jax.random.PRNGKey(0)
    kx, kwq, kbq, kwp, kbp = jax.random.split(key, 5)

    x = jax.random.normal(kx, (B, N, D), dtype=jnp.float32)
    w_qkv = jax.random.normal(kwq, (D, 3 * D), dtype=jnp.float32) * 0.05
    b_qkv = jax.random.normal(kbq, (1, 3 * D), dtype=jnp.float32) * 0.05
    w_proj = jax.random.normal(kwp, (D, D), dtype=jnp.float32) * 0.05
    b_proj = jax.random.normal(kbp, (1, D), dtype=jnp.float32) * 0.05

    out = multi_head_self_attention(x, w_qkv, b_qkv, w_proj, b_proj,
                                    num_heads=H)
    out = jax.block_until_ready(out)

    ref = reference_mhsa(x, w_qkv, b_qkv, w_proj, b_proj, num_heads=H)
    assert out.shape == (B, N, D)
    # bf16 MXU matmuls with f32 accumulation -> loosened tolerance vs f32 ref.
    assert jnp.allclose(out, ref, atol=3e-2, rtol=3e-2), "mismatch vs reference"

    print("KERNEL_OK")
</pallas_src>

<mosaic_0001>
module attributes {stable_mosaic.version = 11 : i64} {
  func.func @mhsa_kernel(%arg0: i32, %arg1: memref<1x8x32xf32, #tpu.memory_space<vmem>>, %arg2: memref<4x32x8xbf16, #tpu.memory_space<vmem>>, %arg3: memref<4x32x8xbf16, #tpu.memory_space<vmem>>, %arg4: memref<4x32x8xbf16, #tpu.memory_space<vmem>>, %arg5: memref<4x1x8xf32, #tpu.memory_space<vmem>>, %arg6: memref<4x1x8xf32, #tpu.memory_space<vmem>>, %arg7: memref<4x1x8xf32, #tpu.memory_space<vmem>>, %arg8: memref<4x8x32xbf16, #tpu.memory_space<vmem>>, %arg9: memref<1x32xf32, #tpu.memory_space<vmem>>, %arg10: memref<1x8x32xf32, #tpu.memory_space<vmem>>, %arg11: memref<8x32xf32, #tpu.memory_space<vmem>>) attributes {dimension_semantics = [#tpu.dimension_semantics<parallel>], iteration_bounds = array<i64: 2>, scalar_prefetch = 0 : i64, scratch_operands = 1 : i64, tpu.core_type = #tpu.core_type<tc>, window_params = [{transform_indices = @transform_0, window_bounds = array<i64: 1, 8, 32>}, {pipeline_mode = #tpu.pipeline_mode<synchronous>, transform_indices = @transform_1, window_bounds = array<i64: 4, 32, 8>}, {pipeline_mode = #tpu.pipeline_mode<synchronous>, transform_indices = @transform_2, window_bounds = array<i64: 4, 32, 8>}, {pipeline_mode = #tpu.pipeline_mode<synchronous>, transform_indices = @transform_3, window_bounds = array<i64: 4, 32, 8>}, {pipeline_mode = #tpu.pipeline_mode<synchronous>, transform_indices = @transform_4, window_bounds = array<i64: 4, 1, 8>}, {pipeline_mode = #tpu.pipeline_mode<synchronous>, transform_indices = @transform_5, window_bounds = array<i64: 4, 1, 8>}, {pipeline_mode = #tpu.pipeline_mode<synchronous>, transform_indices = @transform_6, window_bounds = array<i64: 4, 1, 8>}, {pipeline_mode = #tpu.pipeline_mode<synchronous>, transform_indices = @transform_7, window_bounds = array<i64: 4, 8, 32>}, {pipeline_mode = #tpu.pipeline_mode<synchronous>, transform_indices = @transform_8, window_bounds = array<i64: 1, 32>}, {transform_indices = @transform_9, window_bounds = array<i64: 1, 8, 32>}]} {
    %c0 = arith.constant 0 : index
    %c0_0 = arith.constant 0 : index
    %c0_1 = arith.constant 0 : index
    %0 = vector.load %arg1[%c0, %c0_0, %c0_1] : memref<1x8x32xf32, #tpu.memory_space<vmem>>, vector<1x8x32xf32>
    %1 = vector.shape_cast %0 : vector<1x8x32xf32> to vector<8x32xf32>
    %2 = arith.truncf %1 : vector<8x32xf32> to vector<8x32xbf16>
    %c0_2 = arith.constant 0 : index
    %c0_3 = arith.constant 0 : index
    %3 = vector.load %arg9[%c0_2, %c0_3] : memref<1x32xf32, #tpu.memory_space<vmem>>, vector<1x32xf32>
    %4 = vector.shape_cast %3 : vector<1x32xf32> to vector<1x32xf32>
    %5 = vector.broadcast %4 : vector<1x32xf32> to vector<8x32xf32>
    %c0_4 = arith.constant 0 : index
    %c0_5 = arith.constant 0 : index
    %6 = vector.load %arg11[%c0_4, %c0_5] : memref<8x32xf32, #tpu.memory_space<vmem>>, vector<8x32xf32>
    tpu.vector_store %arg11[%c0_4, %c0_5], %5 {strides = array<i32>} : memref<8x32xf32, #tpu.memory_space<vmem>>, vector<8x32xf32>,
    %c0_i32 = arith.constant 0 : i32
    %c4_i32 = arith.constant 4 : i32
    %7 = arith.addi %c0_i32, %c4_i32 : i32
    %c1_i32 = arith.constant 1 : i32
    scf.for %arg12 = %c0_i32 to %7 step %c1_i32  : i32 {
      %c1_i32_12 = arith.constant 1 : i32
      %12 = arith.muli %arg12, %c1_i32_12 : i32
      %c0_i32_13 = arith.constant 0 : i32
      %13 = arith.addi %c0_i32_13, %12 : i32
      %14 = arith.index_cast %13 : i32 to index
      %c0_14 = arith.constant 0 : index
      %c0_15 = arith.constant 0 : index
      %15 = vector.load %arg2[%14, %c0_14, %c0_15] : memref<4x32x8xbf16, #tpu.memory_space<vmem>>, vector<1x32x8xbf16>
      %16 = vector.shape_cast %15 : vector<1x32x8xbf16> to vector<32x8xbf16>
      %17 = arith.index_cast %13 : i32 to index
      %c0_16 = arith.constant 0 : index
      %c0_17 = arith.constant 0 : index
      %18 = vector.load %arg3[%17, %c0_16, %c0_17] : memref<4x32x8xbf16, #tpu.memory_space<vmem>>, vector<1x32x8xbf16>
      %19 = vector.shape_cast %18 : vector<1x32x8xbf16> to vector<32x8xbf16>
      %20 = arith.index_cast %13 : i32 to index
      %c0_18 = arith.constant 0 : index
      %c0_19 = arith.constant 0 : index
      %21 = vector.load %arg4[%20, %c0_18, %c0_19] : memref<4x32x8xbf16, #tpu.memory_space<vmem>>, vector<1x32x8xbf16>
      %22 = vector.shape_cast %21 : vector<1x32x8xbf16> to vector<32x8xbf16>
      %cst = arith.constant dense<0.000000e+00> : vector<8x8xf32>
      %23 = tpu.matmul %2, %16, %cst {dimension_numbers = #tpu.dot_dimension_numbers<[1], [0], [0], [1], [0, 0, 1, 1], [], []>} : vector<8x32xbf16>, vector<32x8xbf16>, vector<8x8xf32> -> vector<8x8xf32>
      %24 = arith.index_cast %13 : i32 to index
      %c0_20 = arith.constant 0 : index
      %c0_21 = arith.constant 0 : index
      %25 = vector.load %arg5[%24, %c0_20, %c0_21] : memref<4x1x8xf32, #tpu.memory_space<vmem>>, vector<1x1x8xf32>
      %26 = vector.shape_cast %25 : vector<1x1x8xf32> to vector<1x8xf32>
      %27 = vector.broadcast %26 : vector<1x8xf32> to vector<8x8xf32>
      %28 = arith.addf %23, %27 : vector<8x8xf32>
      %cst_22 = arith.constant dense<0.000000e+00> : vector<8x8xf32>
      %29 = tpu.matmul %2, %19, %cst_22 {dimension_numbers = #tpu.dot_dimension_numbers<[1], [0], [0], [1], [0, 0, 1, 1], [], []>} : vector<8x32xbf16>, vector<32x8xbf16>, vector<8x8xf32> -> vector<8x8xf32>
      %30 = arith.index_cast %13 : i32 to index
      %c0_23 = arith.constant 0 : index
      %c0_24 = arith.constant 0 : index
      %31 = vector.load %arg6[%30, %c0_23, %c0_24] : memref<4x1x8xf32, #tpu.memory_space<vmem>>, vector<1x1x8xf32>
      %32 = vector.shape_cast %31 : vector<1x1x8xf32> to vector<1x8xf32>
      %33 = vector.broadcast %32 : vector<1x8xf32> to vector<8x8xf32>
      %34 = arith.addf %29, %33 : vector<8x8xf32>
      %cst_25 = arith.constant dense<0.000000e+00> : vector<8x8xf32>
      %35 = tpu.matmul %2, %22, %cst_25 {dimension_numbers = #tpu.dot_dimension_numbers<[1], [0], [0], [1], [0, 0, 1, 1], [], []>} : vector<8x32xbf16>, vector<32x8xbf16>, vector<8x8xf32> -> vector<8x8xf32>
      %36 = arith.index_cast %13 : i32 to index
      %c0_26 = arith.constant 0 : index
      %c0_27 = arith.constant 0 : index
      %37 = vector.load %arg7[%36, %c0_26, %c0_27] : memref<4x1x8xf32, #tpu.memory_space<vmem>>, vector<1x1x8xf32>
      %38 = vector.shape_cast %37 : vector<1x1x8xf32> to vector<1x8xf32>
      %39 = vector.broadcast %38 : vector<1x8xf32> to vector<8x8xf32>
      %40 = arith.addf %35, %39 : vector<8x8xf32>
      %cst_28 = arith.constant 0.353553385 : f32
      %41 = vector.broadcast %cst_28 : f32 to vector<8x8xf32>
      %42 = arith.mulf %28, %41 : vector<8x8xf32>
      %43 = arith.truncf %42 : vector<8x8xf32> to vector<8x8xbf16>
      %44 = arith.truncf %34 : vector<8x8xf32> to vector<8x8xbf16>
      %45 = arith.truncf %40 : vector<8x8xf32> to vector<8x8xbf16>
      %cst_29 = arith.constant dense<0.000000e+00> : vector<8x8xf32>
      %46 = tpu.matmul %43, %44, %cst_29 {dimension_numbers = #tpu.dot_dimension_numbers<[1], [1], [0], [0], [0, 0, 1, 0], [], []>} : vector<8x8xbf16>, vector<8x8xbf16>, vector<8x8xf32> -> vector<8x8xf32>
      %cst_30 = arith.constant dense<0xFF800000> : vector<8xf32>
      %47 = vector.multi_reduction <maximumf>, %46, %cst_30 [1] : vector<8x8xf32> to vector<8xf32>
      %48 = vector.shape_cast %47 : vector<8xf32> to vector<8x1xf32>
      %49 = vector.broadcast %48 : vector<8x1xf32> to vector<8x8xf32>
      %50 = arith.subf %46, %49 : vector<8x8xf32>
      %51 = math.exp %50 : vector<8x8xf32>
      %cst_31 = arith.constant dense<0.000000e+00> : vector<8xf32>
      %52 = vector.multi_reduction <add>, %51, %cst_31 [1] : vector<8x8xf32> to vector<8xf32>
      %53 = vector.shape_cast %52 : vector<8xf32> to vector<8x1xf32>
      %54 = tpu.reciprocal %53 {approx = true} : vector<8x1xf32> -> vector<8x1xf32>
      %55 = vector.broadcast %54 : vector<8x1xf32> to vector<8x8xf32>
      %56 = arith.mulf %51, %55 : vector<8x8xf32>
      %57 = arith.truncf %56 : vector<8x8xf32> to vector<8x8xbf16>
      %cst_32 = arith.constant dense<0.000000e+00> : vector<8x8xf32>
      %58 = tpu.matmul %57, %45, %cst_32 {dimension_numbers = #tpu.dot_dimension_numbers<[1], [0], [0], [1], [0, 0, 1, 1], [], []>} : vector<8x8xbf16>, vector<8x8xbf16>, vector<8x8xf32> -> vector<8x8xf32>
      %c0_33 = arith.constant 0 : index
      %c0_34 = arith.constant 0 : index
      %59 = vector.load %arg11[%c0_33, %c0_34] : memref<8x32xf32, #tpu.memory_space<vmem>>, vector<8x32xf32>
      %60 = arith.truncf %58 : vector<8x8xf32> to vector<8x8xbf16>
      %61 = arith.index_cast %13 : i32 to index
      %c0_35 = arith.constant 0 : index
      %c0_36 = arith.constant 0 : index
      %62 = vector.load %arg8[%61, %c0_35, %c0_36] : memref<4x8x32xbf16, #tpu.memory_space<vmem>>, vector<1x8x32xbf16>
      %63 = vector.shape_cast %62 : vector<1x8x32xbf16> to vector<8x32xbf16>
      %cst_37 = arith.constant dense<0.000000e+00> : vector<8x32xf32>
      %64 = tpu.matmul %60, %63, %cst_37 {dimension_numbers = #tpu.dot_dimension_numbers<[1], [0], [0], [1], [0, 0, 1, 1], [], []>} : vector<8x8xbf16>, vector<8x32xbf16>, vector<8x32xf32> -> vector<8x32xf32>
      %65 = arith.addf %59, %64 : vector<8x32xf32>
      %c0_38 = arith.constant 0 : index
      %c0_39 = arith.constant 0 : index
      %66 = vector.load %arg11[%c0_38, %c0_39] : memref<8x32xf32, #tpu.memory_space<vmem>>, vector<8x32xf32>
      tpu.vector_store %arg11[%c0_38, %c0_39], %65 {strides = array<i32>} : memref<8x32xf32, #tpu.memory_space<vmem>>, vector<8x32xf32>,
    }
    %c4_i32_6 = arith.constant 4 : i32
    %c0_7 = arith.constant 0 : index
    %c0_8 = arith.constant 0 : index
    %8 = vector.load %arg11[%c0_7, %c0_8] : memref<8x32xf32, #tpu.memory_space<vmem>>, vector<8x32xf32>
    %c0_9 = arith.constant 0 : index
    %c0_10 = arith.constant 0 : index
    %c0_11 = arith.constant 0 : index
    %9 = vector.load %arg10[%c0_9, %c0_10, %c0_11] : memref<1x8x32xf32, #tpu.memory_space<vmem>>, vector<1x8x32xf32>
    %10 = vector.shape_cast %9 : vector<1x8x32xf32> to vector<8x32xf32>
    %11 = vector.shape_cast %8 : vector<8x32xf32> to vector<1x8x32xf32>
    tpu.vector_store %arg10[%c0_9, %c0_10, %c0_11], %11 {strides = array<i32>} : memref<1x8x32xf32, #tpu.memory_space<vmem>>, vector<1x8x32xf32>,
    return
  }
  func.func @transform_0(%arg0: i32) -> (i32, i32, i32) {
    %c0_i32 = arith.constant 0 : i32
    %c0_i32_0 = arith.constant 0 : i32
    %c0_i32_1 = arith.constant 0 : i32
    return %arg0, %c0_i32, %c0_i32_0 : i32, i32, i32
  }
  func.func @transform_1(%arg0: i32) -> (i32, i32, i32) {
    %c0_i32 = arith.constant 0 : i32
    %c0_i32_0 = arith.constant 0 : i32
    %c0_i32_1 = arith.constant 0 : i32
    %c0_i32_2 = arith.constant 0 : i32
    return %c0_i32, %c0_i32_0, %c0_i32_1 : i32, i32, i32
  }
  func.func @transform_2(%arg0: i32) -> (i32, i32, i32) {
    %c0_i32 = arith.constant 0 : i32
    %c0_i32_0 = arith.constant 0 : i32
    %c0_i32_1 = arith.constant 0 : i32
    %c0_i32_2 = arith.constant 0 : i32
    return %c0_i32, %c0_i32_0, %c0_i32_1 : i32, i32, i32
  }
  func.func @transform_3(%arg0: i32) -> (i32, i32, i32) {
    %c0_i32 = arith.constant 0 : i32
    %c0_i32_0 = arith.constant 0 : i32
    %c0_i32_1 = arith.constant 0 : i32
    %c0_i32_2 = arith.constant 0 : i32
    return %c0_i32, %c0_i32_0, %c0_i32_1 : i32, i32, i32
  }
  func.func @transform_4(%arg0: i32) -> (i32, i32, i32) {
    %c0_i32 = arith.constant 0 : i32
    %c0_i32_0 = arith.constant 0 : i32
    %c0_i32_1 = arith.constant 0 : i32
    %c0_i32_2 = arith.constant 0 : i32
    return %c0_i32, %c0_i32_0, %c0_i32_1 : i32, i32, i32
  }
  func.func @transform_5(%arg0: i32) -> (i32, i32, i32) {
    %c0_i32 = arith.constant 0 : i32
    %c0_i32_0 = arith.constant 0 : i32
    %c0_i32_1 = arith.constant 0 : i32
    %c0_i32_2 = arith.constant 0 : i32
    return %c0_i32, %c0_i32_0, %c0_i32_1 : i32, i32, i32
  }
  func.func @transform_6(%arg0: i32) -> (i32, i32, i32) {
    %c0_i32 = arith.constant 0 : i32
    %c0_i32_0 = arith.constant 0 : i32
    %c0_i32_1 = arith.constant 0 : i32
    %c0_i32_2 = arith.constant 0 : i32
    return %c0_i32, %c0_i32_0, %c0_i32_1 : i32, i32, i32
  }
  func.func @transform_7(%arg0: i32) -> (i32, i32, i32) {
    %c0_i32 = arith.constant 0 : i32
    %c0_i32_0 = arith.constant 0 : i32
    %c0_i32_1 = arith.constant 0 : i32
    %c0_i32_2 = arith.constant 0 : i32
    return %c0_i32, %c0_i32_0, %c0_i32_1 : i32, i32, i32
  }
  func.func @transform_8(%arg0: i32) -> (i32, i32) {
    %c0_i32 = arith.constant 0 : i32
    %c0_i32_0 = arith.constant 0 : i32
    %c0_i32_1 = arith.constant 0 : i32
    return %c0_i32, %c0_i32_0 : i32, i32
  }
  func.func @transform_9(%arg0: i32) -> (i32, i32, i32) {
    %c0_i32 = arith.constant 0 : i32
    %c0_i32_0 = arith.constant 0 : i32
    %c0_i32_1 = arith.constant 0 : i32
    return %arg0, %c0_i32, %c0_i32_0 : i32, i32, i32
  }
}

module attributes {stable_mosaic.version = 11 : i64} {
  func.func @mhsa_kernel(%arg0: i32, %arg1: memref<1x8x32xf32, #tpu.memory_space<vmem>>, %arg2: memref<4x32x8xbf16, #tpu.memory_space<vmem>>, %arg3: memref<4x32x8xbf16, #tpu.memory_space<vmem>>, %arg4: memref<4x32x8xbf16, #tpu.memory_space<vmem>>, %arg5: memref<4x1x8xf32, #tpu.memory_space<vmem>>, %arg6: memref<4x1x8xf32, #tpu.memory_space<vmem>>, %arg7: memref<4x1x8xf32, #tpu.memory_space<vmem>>, %arg8: memref<4x8x32xbf16, #tpu.memory_space<vmem>>, %arg9: memref<1x32xf32, #tpu.memory_space<vmem>>, %arg10: memref<1x8x32xf32, #tpu.memory_space<vmem>>, %arg11: memref<8x32xf32, #tpu.memory_space<vmem>>) attributes {dimension_semantics = [#tpu.dimension_semantics<parallel>], iteration_bounds = array<i64: 2>, scalar_prefetch = 0 : i64, scratch_operands = 1 : i64, tpu.core_type = #tpu.core_type<tc>, window_params = [{transform_indices = @transform_0, window_bounds = array<i64: 1, 8, 32>}, {pipeline_mode = #tpu.pipeline_mode<synchronous>, transform_indices = @transform_1, window_bounds = array<i64: 4, 32, 8>}, {pipeline_mode = #tpu.pipeline_mode<synchronous>, transform_indices = @transform_2, window_bounds = array<i64: 4, 32, 8>}, {pipeline_mode = #tpu.pipeline_mode<synchronous>, transform_indices = @transform_3, window_bounds = array<i64: 4, 32, 8>}, {pipeline_mode = #tpu.pipeline_mode<synchronous>, transform_indices = @transform_4, window_bounds = array<i64: 4, 1, 8>}, {pipeline_mode = #tpu.pipeline_mode<synchronous>, transform_indices = @transform_5, window_bounds = array<i64: 4, 1, 8>}, {pipeline_mode = #tpu.pipeline_mode<synchronous>, transform_indices = @transform_6, window_bounds = array<i64: 4, 1, 8>}, {pipeline_mode = #tpu.pipeline_mode<synchronous>, transform_indices = @transform_7, window_bounds = array<i64: 4, 8, 32>}, {pipeline_mode = #tpu.pipeline_mode<synchronous>, transform_indices = @transform_8, window_bounds = array<i64: 1, 32>}, {transform_indices = @transform_9, window_bounds = array<i64: 1, 8, 32>}]} {
    %c0 = arith.constant 0 : index
    %c0_0 = arith.constant 0 : index
    %c0_1 = arith.constant 0 : index
    %0 = vector.load %arg1[%c0, %c0_0, %c0_1] : memref<1x8x32xf32, #tpu.memory_space<vmem>>, vector<1x8x32xf32>
    %1 = vector.shape_cast %0 : vector<1x8x32xf32> to vector<8x32xf32>
    %2 = arith.truncf %1 : vector<8x32xf32> to vector<8x32xbf16>
    %c0_2 = arith.constant 0 : index
    %c0_3 = arith.constant 0 : index
    %3 = vector.load %arg9[%c0_2, %c0_3] : memref<1x32xf32, #tpu.memory_space<vmem>>, vector<1x32xf32>
    %4 = vector.shape_cast %3 : vector<1x32xf32> to vector<1x32xf32>
    %5 = vector.broadcast %4 : vector<1x32xf32> to vector<8x32xf32>
    %c0_4 = arith.constant 0 : index
    %c0_5 = arith.constant 0 : index
    %6 = vector.load %arg11[%c0_4, %c0_5] : memref<8x32xf32, #tpu.memory_space<vmem>>, vector<8x32xf32>
    tpu.vector_store %arg11[%c0_4, %c0_5], %5 {strides = array<i32>} : memref<8x32xf32, #tpu.memory_space<vmem>>, vector<8x32xf32>,
    %c0_i32 = arith.constant 0 : i32
    %c4_i32 = arith.constant 4 : i32
    %7 = arith.addi %c0_i32, %c4_i32 : i32
    %c1_i32 = arith.constant 1 : i32
    scf.for %arg12 = %c0_i32 to %7 step %c1_i32  : i32 {
      %c1_i32_12 = arith.constant 1 : i32
      %12 = arith.muli %arg12, %c1_i32_12 : i32
      %c0_i32_13 = arith.constant 0 : i32
      %13 = arith.addi %c0_i32_13, %12 : i32
      %14 = arith.index_cast %13 : i32 to index
      %c0_14 = arith.constant 0 : index
      %c0_15 = arith.constant 0 : index
      %15 = vector.load %arg2[%14, %c0_14, %c0_15] : memref<4x32x8xbf16, #tpu.memory_space<vmem>>, vector<1x32x8xbf16>
      %16 = vector.shape_cast %15 : vector<1x32x8xbf16> to vector<32x8xbf16>
      %17 = arith.index_cast %13 : i32 to index
      %c0_16 = arith.constant 0 : index
      %c0_17 = arith.constant 0 : index
      %18 = vector.load %arg3[%17, %c0_16, %c0_17] : memref<4x32x8xbf16, #tpu.memory_space<vmem>>, vector<1x32x8xbf16>
      %19 = vector.shape_cast %18 : vector<1x32x8xbf16> to vector<32x8xbf16>
      %20 = arith.index_cast %13 : i32 to index
      %c0_18 = arith.constant 0 : index
      %c0_19 = arith.constant 0 : index
      %21 = vector.load %arg4[%20, %c0_18, %c0_19] : memref<4x32x8xbf16, #tpu.memory_space<vmem>>, vector<1x32x8xbf16>
      %22 = vector.shape_cast %21 : vector<1x32x8xbf16> to vector<32x8xbf16>
      %cst = arith.constant dense<0.000000e+00> : vector<8x8xf32>
      %23 = tpu.matmul %2, %16, %cst {dimension_numbers = #tpu.dot_dimension_numbers<[1], [0], [0], [1], [0, 0, 1, 1], [], []>} : vector<8x32xbf16>, vector<32x8xbf16>, vector<8x8xf32> -> vector<8x8xf32>
      %24 = arith.index_cast %13 : i32 to index
      %c0_20 = arith.constant 0 : index
      %c0_21 = arith.constant 0 : index
      %25 = vector.load %arg5[%24, %c0_20, %c0_21] : memref<4x1x8xf32, #tpu.memory_space<vmem>>, vector<1x1x8xf32>
      %26 = vector.shape_cast %25 : vector<1x1x8xf32> to vector<1x8xf32>
      %27 = vector.broadcast %26 : vector<1x8xf32> to vector<8x8xf32>
      %28 = arith.addf %23, %27 : vector<8x8xf32>
      %cst_22 = arith.constant dense<0.000000e+00> : vector<8x8xf32>
      %29 = tpu.matmul %2, %19, %cst_22 {dimension_numbers = #tpu.dot_dimension_numbers<[1], [0], [0], [1], [0, 0, 1, 1], [], []>} : vector<8x32xbf16>, vector<32x8xbf16>, vector<8x8xf32> -> vector<8x8xf32>
      %30 = arith.index_cast %13 : i32 to index
      %c0_23 = arith.constant 0 : index
      %c0_24 = arith.constant 0 : index
      %31 = vector.load %arg6[%30, %c0_23, %c0_24] : memref<4x1x8xf32, #tpu.memory_space<vmem>>, vector<1x1x8xf32>
      %32 = vector.shape_cast %31 : vector<1x1x8xf32> to vector<1x8xf32>
      %33 = vector.broadcast %32 : vector<1x8xf32> to vector<8x8xf32>
      %34 = arith.addf %29, %33 : vector<8x8xf32>
      %cst_25 = arith.constant dense<0.000000e+00> : vector<8x8xf32>
      %35 = tpu.matmul %2, %22, %cst_25 {dimension_numbers = #tpu.dot_dimension_numbers<[1], [0], [0], [1], [0, 0, 1, 1], [], []>} : vector<8x32xbf16>, vector<32x8xbf16>, vector<8x8xf32> -> vector<8x8xf32>
      %36 = arith.index_cast %13 : i32 to index
      %c0_26 = arith.constant 0 : index
      %c0_27 = arith.constant 0 : index
      %37 = vector.load %arg7[%36, %c0_26, %c0_27] : memref<4x1x8xf32, #tpu.memory_space<vmem>>, vector<1x1x8xf32>
      %38 = vector.shape_cast %37 : vector<1x1x8xf32> to vector<1x8xf32>
      %39 = vector.broadcast %38 : vector<1x8xf32> to vector<8x8xf32>
      %40 = arith.addf %35, %39 : vector<8x8xf32>
      %cst_28 = arith.constant 0.353553385 : f32
      %41 = vector.broadcast %cst_28 : f32 to vector<8x8xf32>
      %42 = arith.mulf %28, %41 : vector<8x8xf32>
      %43 = arith.truncf %42 : vector<8x8xf32> to vector<8x8xbf16>
      %44 = arith.truncf %34 : vector<8x8xf32> to vector<8x8xbf16>
      %45 = arith.truncf %40 : vector<8x8xf32> to vector<8x8xbf16>
      %cst_29 = arith.constant dense<0.000000e+00> : vector<8x8xf32>
      %46 = tpu.matmul %43, %44, %cst_29 {dimension_numbers = #tpu.dot_dimension_numbers<[1], [1], [0], [0], [0, 0, 1, 0], [], []>} : vector<8x8xbf16>, vector<8x8xbf16>, vector<8x8xf32> -> vector<8x8xf32>
      %cst_30 = arith.constant dense<0xFF800000> : vector<8xf32>
      %47 = vector.multi_reduction <maximumf>, %46, %cst_30 [1] : vector<8x8xf32> to vector<8xf32>
      %48 = vector.shape_cast %47 : vector<8xf32> to vector<8x1xf32>
      %49 = vector.broadcast %48 : vector<8x1xf32> to vector<8x8xf32>
      %50 = arith.subf %46, %49 : vector<8x8xf32>
      %51 = math.exp %50 : vector<8x8xf32>
      %cst_31 = arith.constant dense<0.000000e+00> : vector<8xf32>
      %52 = vector.multi_reduction <add>, %51, %cst_31 [1] : vector<8x8xf32> to vector<8xf32>
      %53 = vector.shape_cast %52 : vector<8xf32> to vector<8x1xf32>
      %54 = tpu.reciprocal %53 {approx = true} : vector<8x1xf32> -> vector<8x1xf32>
      %55 = vector.broadcast %54 : vector<8x1xf32> to vector<8x8xf32>
      %56 = arith.mulf %51, %55 : vector<8x8xf32>
      %57 = arith.truncf %56 : vector<8x8xf32> to vector<8x8xbf16>
      %cst_32 = arith.constant dense<0.000000e+00> : vector<8x8xf32>
      %58 = tpu.matmul %57, %45, %cst_32 {dimension_numbers = #tpu.dot_dimension_numbers<[1], [0], [0], [1], [0, 0, 1, 1], [], []>} : vector<8x8xbf16>, vector<8x8xbf16>, vector<8x8xf32> -> vector<8x8xf32>
      %c0_33 = arith.constant 0 : index
      %c0_34 = arith.constant 0 : index
      %59 = vector.load %arg11[%c0_33, %c0_34] : memref<8x32xf32, #tpu.memory_space<vmem>>, vector<8x32xf32>
      %60 = arith.truncf %58 : vector<8x8xf32> to vector<8x8xbf16>
      %61 = arith.index_cast %13 : i32 to index
      %c0_35 = arith.constant 0 : index
      %c0_36 = arith.constant 0 : index
      %62 = vector.load %arg8[%61, %c0_35, %c0_36] : memref<4x8x32xbf16, #tpu.memory_space<vmem>>, vector<1x8x32xbf16>
      %63 = vector.shape_cast %62 : vector<1x8x32xbf16> to vector<8x32xbf16>
      %cst_37 = arith.constant dense<0.000000e+00> : vector<8x32xf32>
      %64 = tpu.matmul %60, %63, %cst_37 {dimension_numbers = #tpu.dot_dimension_numbers<[1], [0], [0], [1], [0, 0, 1, 1], [], []>} : vector<8x8xbf16>, vector<8x32xbf16>, vector<8x32xf32> -> vector<8x32xf32>
      %65 = arith.addf %59, %64 : vector<8x32xf32>
      %c0_38 = arith.constant 0 : index
      %c0_39 = arith.constant 0 : index
      %66 = vector.load %arg11[%c0_38, %c0_39] : memref<8x32xf32, #tpu.memory_space<vmem>>, vector<8x32xf32>
      tpu.vector_store %arg11[%c0_38, %c0_39], %65 {strides = array<i32>} : memref<8x32xf32, #tpu.memory_space<vmem>>, vector<8x32xf32>,
    }
    %c4_i32_6 = arith.constant 4 : i32
    %c0_7 = arith.constant 0 : index
    %c0_8 = arith.constant 0 : index
    %8 = vector.load %arg11[%c0_7, %c0_8] : memref<8x32xf32, #tpu.memory_space<vmem>>, vector<8x32xf32>
    %c0_9 = arith.constant 0 : index
    %c0_10 = arith.constant 0 : index
    %c0_11 = arith.constant 0 : index
    %9 = vector.load %arg10[%c0_9, %c0_10, %c0_11] : memref<1x8x32xf32, #tpu.memory_space<vmem>>, vector<1x8x32xf32>
    %10 = vector.shape_cast %9 : vector<1x8x32xf32> to vector<8x32xf32>
    %11 = vector.shape_cast %8 : vector<8x32xf32> to vector<1x8x32xf32>
    tpu.vector_store %arg10[%c0_9, %c0_10, %c0_11], %11 {strides = array<i32>} : memref<1x8x32xf32, #tpu.memory_space<vmem>>, vector<1x8x32xf32>,
    return
  }
  func.func @transform_0(%arg0: i32) -> (i32, i32, i32) {
    %c0_i32 = arith.constant 0 : i32
    %c0_i32_0 = arith.constant 0 : i32
    %c0_i32_1 = arith.constant 0 : i32
    return %arg0, %c0_i32, %c0_i32_0 : i32, i32, i32
  }
  func.func @transform_1(%arg0: i32) -> (i32, i32, i32) {
    %c0_i32 = arith.constant 0 : i32
    %c0_i32_0 = arith.constant 0 : i32
    %c0_i32_1 = arith.constant 0 : i32
    %c0_i32_2 = arith.constant 0 : i32
    return %c0_i32, %c0_i32_0, %c0_i32_1 : i32, i32, i32
  }
  func.func @transform_2(%arg0: i32) -> (i32, i32, i32) {
    %c0_i32 = arith.constant 0 : i32
    %c0_i32_0 = arith.constant 0 : i32
    %c0_i32_1 = arith.constant 0 : i32
    %c0_i32_2 = arith.constant 0 : i32
    return %c0_i32, %c0_i32_0, %c0_i32_1 : i32, i32, i32
  }
  func.func @transform_3(%arg0: i32) -> (i32, i32, i32) {
    %c0_i32 = arith.constant 0 : i32
    %c0_i32_0 = arith.constant 0 : i32
    %c0_i32_1 = arith.constant 0 : i32
    %c0_i32_2 = arith.constant 0 : i32
    return %c0_i32, %c0_i32_0, %c0_i32_1 : i32, i32, i32
  }
  func.func @transform_4(%arg0: i32) -> (i32, i32, i32) {
    %c0_i32 = arith.constant 0 : i32
    %c0_i32_0 = arith.constant 0 : i32
    %c0_i32_1 = arith.constant 0 : i32
    %c0_i32_2 = arith.constant 0 : i32
    return %c0_i32, %c0_i32_0, %c0_i32_1 : i32, i32, i32
  }
  func.func @transform_5(%arg0: i32) -> (i32, i32, i32) {
    %c0_i32 = arith.constant 0 : i32
    %c0_i32_0 = arith.constant 0 : i32
    %c0_i32_1 = arith.constant 0 : i32
    %c0_i32_2 = arith.constant 0 : i32
    return %c0_i32, %c0_i32_0, %c0_i32_1 : i32, i32, i32
  }
  func.func @transform_6(%arg0: i32) -> (i32, i32, i32) {
    %c0_i32 = arith.constant 0 : i32
    %c0_i32_0 = arith.constant 0 : i32
    %c0_i32_1 = arith.constant 0 : i32
    %c0_i32_2 = arith.constant 0 : i32
    return %c0_i32, %c0_i32_0, %c0_i32_1 : i32, i32, i32
  }
  func.func @transform_7(%arg0: i32) -> (i32, i32, i32) {
    %c0_i32 = arith.constant 0 : i32
    %c0_i32_0 = arith.constant 0 : i32
    %c0_i32_1 = arith.constant 0 : i32
    %c0_i32_2 = arith.constant 0 : i32
    return %c0_i32, %c0_i32_0, %c0_i32_1 : i32, i32, i32
  }
  func.func @transform_8(%arg0: i32) -> (i32, i32) {
    %c0_i32 = arith.constant 0 : i32
    %c0_i32_0 = arith.constant 0 : i32
    %c0_i32_1 = arith.constant 0 : i32
    return %c0_i32, %c0_i32_0 : i32, i32
  }
  func.func @transform_9(%arg0: i32) -> (i32, i32, i32) {
    %c0_i32 = arith.constant 0 : i32
    %c0_i32_0 = arith.constant 0 : i32
    %c0_i32_1 = arith.constant 0 : i32
    return %arg0, %c0_i32, %c0_i32_0 : i32, i32, i32
  }
}

</mosaic_0001>

<bundles_post_ra>
// kernel: tpu_custom_call.1
= control target key start
LH: loop header
LB: loop body
LE: loop exit
PB: predicated region body
PF: predicated region fallthrough
CT: control target
= control target key end

     0   :  { %s1246_s0 = inlined_call_operand.vmem [shape: f32[2,8,32], index: 0, kind: input, shape index: {}]   ;;  %s1247_s1 = inlined_call_operand.vmem [shape: bf16[4,32,8], index: 1, kind: input, shape index: {}]   ;;  %s1248_s2 = inlined_call_operand.vmem [shape: bf16[4,32,8], index: 2, kind: input, shape index: {}]   ;;  %s1249_s3 = inlined_call_operand.vmem [shape: bf16[4,32,8], index: 3, kind: input, shape index: {}]   ;;  %s1250_s4 = inlined_call_operand.vmem [shape: f32[4,1,8], index: 4, kind: input, shape index: {}]   ;;  %s1251_s5 = inlined_call_operand.vmem [shape: f32[4,1,8], index: 5, kind: input, shape index: {}]   ;;  %s1252_s6 = inlined_call_operand.vmem [shape: f32[4,1,8], index: 6, kind: input, shape index: {}]   ;;  %s1253_s7 = inlined_call_operand.vmem [shape: bf16[4,8,32], index: 7, kind: input, shape index: {}]   ;;  %s1254_s8 = inlined_call_operand.vmem [shape: f32[1,32], index: 8, kind: input, shape index: {}]   ;;  %s1255_s9 = inlined_call_operand.hbm [shape: f32[2,8,32], index: 9, kind: output, shape index: {}]  }
   0x1   :  { %1257 = sst [smem:[#allocation6_spill]] %s1246_s0 }
   0x2   :  { %14 = vsyncpa [#allocation4], 0 }
   0x3   :  { %16 = vsyncpa [#allocation4 + $0x1], 0  ;;  %s1077_s30 = smov 0   ;;  %s1079_s10 = smov 0  }
   0x4   :  { %s1081_s11 = smov 0   ;;  %s1083_s12 = smov 0  }
   0x5 LB: > { %s1098_s13 = sadd.s32 4294967295, %s1018_s12   ;;  %s802_s14 = sadd.s32 4294967294, %s1018_s12   ;;  %s1018_s12 = sphi %s1083_s12, %s1267_s12   ;;  %s1014_s11 = sphi %s1081_s11, %s1266_s11   ;;  %s1010_s10 = sphi %s1079_s10, %s1265_s10   ;;  %s1006_s30 = sphi %s1077_s30, %s1264_s30  }
   0x6   : > { %s1102_s15 = sadd.s32 1, %s1018_s12   ;;  %s223_s16 = sadd.s32 1, %s1014_s11 }
   0x7   : > { %s220_s17 = ssub.s32 %s1018_s12, %s1102_s15  ;;  %p233_p0 = scmp.ne.s32.totalorder %s1014_s11, %s1010_s10 }
   0x8   : > { %p221_p1 = scmp.eq.s32.totalorder %s220_s17, 0  ;;  %p234_p2 = scmp.eq.s32.totalorder %s1098_s13, 1 }
   0x9   : > { %p239_p3 = scmp.ne.s32.totalorder %s1010_s10, %s1006_s30  ;;  %p240_p4 = scmp.eq.s32.totalorder %s802_s14, 1 }
   0xa   : > { %s1113_s18 = scalar_select %p221_p1, %s1014_s11, %s223_s16  }
   0xb   : > { %p1115_p5 = por %p234_p2, %p233_p0  ;;  %p1119_p6 = por %p240_p4, %p239_p3 }
   0xc   : > { %p805_p7 = scmp.ge.s32.totalorder %s1018_s12, 1  ;;  %p289_p8 = scmp.lt.s32.totalorder %s1018_s12, 3 }
   0xe   : > { %p290_p9 = pnand %p805_p7, %p289_p8 }
   0xf   : > { %s1256_s21 = sand.u32 (!%p290_p9), 1, %s1010_s10   ;;  %p324_p10 = scmp.lt.s32.totalorder (!%p290_p9), %s1098_s13, 1  ;;  %v808_v0 = vld [vmem:[%s1254_s8] ss:$0 sm:$0xff] (!%p290_p9)  ;;  %vm338_vm0 = vcmask (!%p290_p9), 261120  }
  0x10   : > { %293 = sbr.rel (%p290_p9) target bundleno = 1241 (0x4d9), region = 56  ;;  %s1132_s24 = sshll.u32 (!%p290_p9), %s1256_s21, 3  ;;  %339 = vst.msk [vmem:[#allocation2] sm:$0xff] (!%p290_p9), %vm338_vm0, %v808_v0 }
  0x11   : > { %s1260_s0 = sld [smem:[#allocation6_spill]] (!%p290_p9)  ;;  %s1142_s16 = smov (!%p290_p9), 0  }
  0x17   : > { %s325_s25 = scalar_select %p324_p10, %s1098_s13, 1 }
  0x19   : > { %s807_s26 = sshll.u32 %s325_s25, 3 }
  0x1a   : > { %s327_s29 = scalar_lea.vmem %s1260_s0, %s807_s26 }
  0x1b   : > { %v329_v1 = vld [vmem:[%s327_s29] sm:$0xff] }
  0x1c   : > { %v1139_v2 = vpack.c.bf16 %v329_v1, %v329_v1 }
  0x1d LB: >> { %v1024_v3 = vmov 0.0   ;;  %s833_s17 = sshll.u32 %s1022_s16, 4  ;;  %vm1025_vm1 = vmmov 0   ;;  %s428_s22 = scalar_lea.vmem %s1251_s5, %s1022_s16  ;;  %vm552_vm2 = vcmask 64512   ;;  %vm614_vm3 = vcmask 1043456   ;;  %v658_v55 = vld [vmem:[#allocation2] sm:$0xff]  ;;  %s1022_s16 = sphi %s1142_s16, %s345_s16  }
  0x1e   : >> { %859 = vmatprep.subr.bf16.mxu1 %v1024_v3  ;;  %851 = vmatprep.subr.bf16.mxu0 %v1024_v3  ;;  %s354_s25 = scalar_lea.vmem %s1248_s2, %s833_s17  ;;  %s348_s28 = scalar_lea.vmem %s1247_s1, %s833_s17  ;;  %v817_v8 = vld [vmem:[%s428_s22] ss:$0 sm:$0xff] }
  0x1f   : >> { %863 = vmatprep.mubr.msk.bf16.mxu1 %vm1025_vm1, %v1024_v3  ;;  %855 = vmatprep.mubr.msk.bf16.mxu0 %vm1025_vm1, %v1024_v3  ;;  %v942_v4 = vld [vmem:[%s354_s25] sm:$0xff]   ;;  %v944_v6 = vld [vmem:[%s354_s25 + $0x8] sm:$0xff]   ;;  %s1159_s14 = scalar_lea.vmem %s1249_s3, %s833_s17  ;;  %s365_s26 = scalar_lea.vmem %s1250_s4, %s1022_s16 }
  0x20   : >> { %v943_v5 = vld [vmem:[%s348_s28] sm:$0xff]   ;;  %860 = vmatpush3.bf16.msra.mxu1 %v942_v4  ;;  %v945_v7 = vld [vmem:[%s348_s28 + $0x8] sm:$0xff]   ;;  %s488_s28 = scalar_lea.vmem %s1252_s6, %s1022_s16  ;;  %s827_s29 = sshll.u32 %s1022_s16, 2 }
  0x21   : >> { %861 = vmatprep.subr.bf16.mxu1 %v1024_v3  ;;  %852 = vmatpush3.bf16.msra.mxu0 %v943_v5  ;;  %v813_v9 = vld [vmem:[%s365_s26] ss:$0 sm:$0xff]  ;;  %v947_v25 = vld [vmem:[%s1159_s14 + $0x8] sm:$0xff]   ;;  %s661_s22 = scalar_lea.vmem %s1253_s7, %s827_s29  ;;  %s345_s16 = sadd.s32 1, %s1022_s16  }
  0x22   : >> { %853 = vmatprep.subr.bf16.mxu0 %v1024_v3  ;;  %v946_v24 = vld [vmem:[%s1159_s14] sm:$0xff]   ;;  %p342_p11 = scmp.ge.s32.totalorder %s345_s16, 4  }
  0x23   : >> { %v821_v39 = vld [vmem:[%s488_s28] ss:$0 sm:$0xff]  ;;  %s830_s23 = sshll.u32 (%p342_p11), %s1098_s13, 7  ;;  %s1261_s25 = scalar_lea.vmem (%p342_p11), [#allocation3], %s1132_s24 }
  0x24   : >> { %862 = vmatpush3.bf16.msra.mxu1 %v944_v6  ;;  %v662_v44 = vld [vmem:[%s661_s22] sm:$0xf]  ;;  %s1206_s27 = scalar_lea.hbm (%p342_p11), %s1255_s9, %s830_s23  ;;  %s1262_s28 = smov (%p342_p11), %s1261_s25 }
  0x25   : >> { %854 = vmatpush3.bf16.msra.mxu0 %v945_v7  ;;  %875 = vmatprep.subr.bf16.mxu1 %v1024_v3  ;;  %v667_v45 = vsel %vm614_vm3, %v662_v44, 0  ;;  %s727_s29 = sshll.u32 (%p342_p11), %s1262_s28, 4  ;;  %s1263_s16 = sand.u32 (%p342_p11), 1, %s1010_s10   ;;  %s728_s29 = int_to_ptr.vmem [resolvable:$true] %s727_s29 }
  0x26   : >> { %867 = vmatprep.subr.bf16.mxu0 %v1024_v3  ;;  %s714_s21 = scalar_lea.sflag (%p342_p11), [#allocation4], %s1263_s16  ;;  %s952_s17 = scalar_lea.vmem (%p342_p11), %s728_s29, 128 }
  0x27   : >> { %864 = vmatmul.mubr.msk.bf16.vlgmr.msra.gmra.mrb[0].mxu1 %vm338_vm0, %v1139_v2  ;;  %p953_p12 = scmp.ne.s32.totalorder (%p342_p11), %s728_s29, %s952_s17  ;;  %s1026_s22 = smov (%p342_p11), [#allocation3]  }
  0x28   : >> { %856 = vmatmul.mubr.msk.bf16.vlgmr.msra.gmra.mrb[0].mxu0 %vm338_vm0, %v1139_v2  ;;  %877 = vmatprep.mubr.msk.bf16.mxu1 %vm1025_vm1, %v1024_v3  ;;  %s956_s13 = sshll.u32 (%p342_p11), %s1026_s22, 4  ;;  %s957_s13 = int_to_ptr.vmem [resolvable:$false] %s956_s13 }
  0x29   : >> { %871 = vmatprep.mubr.msk.bf16.mxu0 %vm1025_vm1, %v1024_v3  ;;  %868 = vmatpush3.bf16.msra.mxu0 %v946_v24  ;;  %p954_p13 = pnand (%p342_p11), %p953_p12, %p1115_p5  ;;  %s958_s0 = scalar_lea.vmem (%p342_p11), %s957_s13, 256 }
  0x2a   : >> { %869 = vmatprep.subr.bf16.mxu0 %v1024_v3  ;;  %p959_p1 = scmp.lt.s32.totalorder (%p342_p11), %s728_s29, %s957_s13  ;;  %p960_p2 = scmp.lt.s32.totalorder (%p342_p11), %s958_s0, %s952_s17 }
  0x2b   : > { %p955_p0 = pneg (%p342_p11), %p954_p13 }
  0x2c   : > { %p961_p3 = por (%p342_p11), %p960_p2, %p959_p1 }
  0x2d   : >> { %870 = vmatpush3.bf16.msra.mxu0 %v947_v25 }
  0x2e   : >> { %881 = vmatprep.subr.bf16.mxu0 %v1024_v3  ;;  %p962_p4 = pnand (%p342_p11), %p961_p3, %p955_p0 }
  0x30   : >> { %872 = vmatmul.mubr.msk.bf16.vlgmr.msra.gmra.mrb[4].mxu0 %vm338_vm0, %v1139_v2 }
  0x31   : >> { %883 = vmatprep.mubr.msk.bf16.mxu0 %vm1025_vm1, %v1024_v3 }
  0xfa   : >> { %v482_v10 = vpop.f32.mrb[0].mxu1 }
  0xfb   : >> { %v483_v11 = vadd.f32 %v817_v8, %v482_v10  ;;  %v865_v12 = vpop.f32.mrb[1].mxu1  ;;  %v422_v13 = vpop.f32.mrb[0].mxu0 }
  0xfc   : >> { %v485_v14 = vpop.f32.mrb[2].mxu1  ;;  %v423_v15 = vadd.f32 %v813_v9, %v422_v13  ;;  %v857_v16 = vpop.f32.mrb[1].mxu0 }
  0xfd   : >> { %v550_v17 = vpack.c.bf16 %v483_v11, %v483_v11  ;;  %v866_v18 = vpop.f32.mrb[3].mxu1  ;;  %v425_v19 = vpop.f32.mrb[2].mxu0 }
  0xfe   : >> { %v858_v20 = vpop.f32.mrb[3].mxu0  ;;  %v548_v22 = vmul.f32 0.35355338, %v423_v15 }
  0xff   : >> { %v557_v21 = vsel %vm552_vm2, %v550_v17, 0 }
 0x100   : >> { %876 = vmatpush3.bf16.xpose.msra.mxu1 %v557_v21  ;;  %v549_v23 = vpack.c.bf16 %v548_v22, %v548_v22 }
 0x101   : >> { %887 = vmatprep.subr.bf16.mxu1 %v1024_v3 }
 0x103   : >> { %v542_v36 = vpop.f32.mrb[4].mxu0 }
 0x104   : >> { %v873_v37 = vpop.f32.mrb[5].mxu0  ;;  %v543_v41 = vadd.f32 %v821_v39, %v542_v36 }
 0x105   : >> { %v545_v38 = vpop.f32.mrb[6].mxu0 }
 0x106   : >> { %v874_v40 = vpop.f32.mrb[7].mxu0  ;;  %v551_v42 = vpack.c.bf16 %v543_v41, %v543_v41 }
 0x107   : >> { %878 = vmatmul.mubr.msk.bf16.vlgmr.msra.gmra.mrb[4].mxu1 %vm552_vm2, %v549_v23 }
 0x108   : >> { %889 = vmatprep.mubr.msk.bf16.mxu1 %vm1025_vm1, %v1024_v3  ;;  %v616_v43 = vsel %vm614_vm3, %v551_v42, 0  ;;  %888 = vmatpush3.bf16.msra.mxu1 %v667_v45 }
 0x109   : >> { %882 = vmatpush3.bf16.msra.mxu0 %v616_v43 }
 0x1da   : >> { %v593_v26 = vpop.f32.mrb[4].mxu1 }
 0x1db   : >> { %v879_v27 = vpop.f32.mrb[5].mxu1  ;;  %v599_v28 = vsel %vm552_vm2, %v593_v26, -inf }
 0x1dc   : >> { %600 = vmax.xlane.f32.xlu0 %v599_v28  ;;  %v596_v29 = vpop.f32.mrb[6].mxu1 }
 0x1dd   : >> { %v880_v30 = vpop.f32.mrb[7].mxu1 }
 0x269   : >> { %v601_v31 = vpop.xlane.xlu0 %600 }
 0x26a   : >> { %v602_v32 = vsub.f32 %v593_v26, %v601_v31 }
 0x26c   : >> { %v603_v33 = vmul.f32 1.442695, %v602_v32 }
 0x26e   : >> { %948 = vpow2.f32 %v603_v33 }
 0x278   : >> { %v949_v34 = vpop.eup %948 }
 0x279   : >> { %v605_v35 = vsel %vm552_vm2, %v949_v34, 0.0 }
 0x27a   : >> { %606 = vadd.xlane.f32.xlu0 %v605_v35 }
 0x307   : >> { %v607_v46 = vpop.xlane.xlu0 %606 }
 0x308   : >> { %950 = vrcp.f32 %v607_v46 }
 0x312   : >> { %v951_v47 = vpop.eup %950 }
 0x313   : >> { %v609_v48 = vmul.f32 %v951_v47, %v949_v34 }
 0x315   : >> { %v610_v49 = vpack.c.bf16 %v609_v48, %v609_v48 }
 0x317   : >> { %884 = vmatmul.mubr.msk.bf16.vlgmr.msra.gmra.mrb[8].mxu0 %vm552_vm2, %v610_v49 }
 0x3ea   : >> { %v652_v50 = vpop.f32.mrb[8].mxu0 }
 0x3eb   : >> { %v659_v51 = vpack.c.bf16 %v652_v50, %v652_v50  ;;  %v885_v52 = vpop.f32.mrb[9].mxu0 }
 0x3ec   : >> { %v655_v53 = vpop.f32.mrb[10].mxu0 }
 0x3ed   : >> { %v886_v54 = vpop.f32.mrb[11].mxu0  ;;  %890 = vmatmul.mubr.msk.bf16.vlgmr.msra.gmra.mrb[8].mxu1 %vm552_vm2, %v659_v51 }
 0x4bd   : > { %344 = sbr.rel (!%p342_p11) target bundleno = 29 (0x1d), region = 105 }
 0x4c0   : >> { %v703_v56 = vpop.f32.mrb[8].mxu1 }
 0x4c1   : >> { %v709_v57 = vadd.f32 %v703_v56, %v658_v55  ;;  %v891_v58 = vpop.f32.mrb[9].mxu1 }
 0x4c2   : >> { %v706_v59 = vpop.f32.mrb[10].mxu1 }
 0x4c3   : >> { %710 = vst.msk [vmem:[#allocation2] sm:$0xff] %vm338_vm0, %v709_v57  ;;  %v892_v60 = vpop.f32.mrb[11].mxu1 }
 0x4ca   : > { %v711_v61 = vld [vmem:[#allocation2] sm:$0xff] }
 0x4cb   : > { %712 = vst.msk [vmem:[%s1261_s25] sm:$0xff] %vm338_vm0, %v711_v61 }
 0x4cc   : > { %965 = shalt.err (!%p962_p4)
}
 0x4cd   : > { %s966_s24 = scalar_lea.hbm %s1206_s27, 128  ;;  %s970_s26 = scalar_lea.hbm %s1255_s9, 256 }
 0x4ce   : > { %p967_p7 = scmp.ne.s32.totalorder %s1206_s27, %s966_s24  ;;  %p971_p10 = scmp.lt.u32.totalorder %s1206_s27, %s1255_s9 }
 0x4cf   : > { %p972_p11 = scmp.lt.u32.totalorder %s970_s26, %s966_s24  ;;  %p974_p13 = scmp.lt.u32.totalorder %s966_s24, %s1206_s27 }
 0x4d0   : > { %p968_p8 = pnand %p967_p7, %p1115_p5 }
 0x4d1   : > { %p973_p12 = por %p972_p11, %p971_p10 }
 0x4d2   : > { %p969_p9 = pneg %p968_p8 }
 0x4d3   : > { %p975_p0 = por %p974_p13, %p973_p12 }
 0x4d5   : > { %p976_p1 = pnand %p975_p0, %p969_p9 }
 0x4d7   : > { %979 = shalt.err (!%p976_p1)
}
 0x4d8   : > { %893 = dma.vmem_to_hbm [thread:$0]  (%p1115_p5), %s728_s29, 128, %s1206_s27, %s714_s21  }
 0x4d9 PF: > { %p899_p2 = scmp.ge.s32.totalorder %s1018_s12, 2  ;;  %s739_s0 = sand.u32 1, %s1006_s30  }
 0x4da   : > { %s740_s16 = scalar_lea.sflag [#allocation4], %s739_s0 }
 0x4db   : > { %p896_p3 = pnand %p899_p2, %p1119_p6 }
 0x4dd   : > { %1001 = dma.done.wait (!%p896_p3), %s740_s16, 128  }
 0x4de   : > { %1003 = vsyncadd (!%p896_p3), %s740_s16, 4294967168  ;;  %p19_p4 = scmp.ge.s32.totalorder %s1102_s15, 4   ;;  %s1264_s30 = smov %s1010_s10 }
 0x4df   : > { %s1265_s10 = smov %s1014_s11  ;;  %s1266_s11 = smov %s1113_s18 }
 0x4e0   : > { %s1267_s12 = smov %s1102_s15  ;;  %21 = sbr.rel (!%p19_p4) target bundleno = 5 (0x5), region = 116 }
 0x4e7   :  { %745 = vsyncpa [#allocation4], 1 }
 0x4e8   :  { %747 = vsyncpa [#allocation4 + $0x1], 1 }

// kernel: tpu_custom_call.1
= control target key start
LH: loop header
LB: loop body
LE: loop exit
PB: predicated region body
PF: predicated region fallthrough
CT: control target
= control target key end

     0   :  { %s1246_s0 = inlined_call_operand.vmem [shape: f32[2,8,32], index: 0, kind: input, shape index: {}]   ;;  %s1247_s1 = inlined_call_operand.vmem [shape: bf16[4,32,8], index: 1, kind: input, shape index: {}]   ;;  %s1248_s2 = inlined_call_operand.vmem [shape: bf16[4,32,8], index: 2, kind: input, shape index: {}]   ;;  %s1249_s3 = inlined_call_operand.vmem [shape: bf16[4,32,8], index: 3, kind: input, shape index: {}]   ;;  %s1250_s4 = inlined_call_operand.vmem [shape: f32[4,1,8], index: 4, kind: input, shape index: {}]   ;;  %s1251_s5 = inlined_call_operand.vmem [shape: f32[4,1,8], index: 5, kind: input, shape index: {}]   ;;  %s1252_s6 = inlined_call_operand.vmem [shape: f32[4,1,8], index: 6, kind: input, shape index: {}]   ;;  %s1253_s7 = inlined_call_operand.vmem [shape: bf16[4,8,32], index: 7, kind: input, shape index: {}]   ;;  %s1254_s8 = inlined_call_operand.vmem [shape: f32[1,32], index: 8, kind: input, shape index: {}]   ;;  %s1255_s9 = inlined_call_operand.hbm [shape: f32[2,8,32], index: 9, kind: output, shape index: {}]  }
   0x1   :  { %1257 = sst [smem:[#allocation6_spill]] %s1246_s0 }
   0x2   :  { %14 = vsyncpa [#allocation4], 0 }
   0x3   :  { %16 = vsyncpa [#allocation4 + $0x1], 0  ;;  %s1077_s30 = smov 0   ;;  %s1079_s10 = smov 0  }
   0x4   :  { %s1081_s11 = smov 0   ;;  %s1083_s12 = smov 0  }
   0x5 LB: > { %s1098_s13 = sadd.s32 4294967295, %s1018_s12   ;;  %s802_s14 = sadd.s32 4294967294, %s1018_s12   ;;  %s1018_s12 = sphi %s1083_s12, %s1267_s12   ;;  %s1014_s11 = sphi %s1081_s11, %s1266_s11   ;;  %s1010_s10 = sphi %s1079_s10, %s1265_s10   ;;  %s1006_s30 = sphi %s1077_s30, %s1264_s30  }
   0x6   : > { %s1102_s15 = sadd.s32 1, %s1018_s12   ;;  %s223_s16 = sadd.s32 1, %s1014_s11 }
   0x7   : > { %s220_s17 = ssub.s32 %s1018_s12, %s1102_s15  ;;  %p233_p0 = scmp.ne.s32.totalorder %s1014_s11, %s1010_s10 }
   0x8   : > { %p221_p1 = scmp.eq.s32.totalorder %s220_s17, 0  ;;  %p234_p2 = scmp.eq.s32.totalorder %s1098_s13, 1 }
   0x9   : > { %p239_p3 = scmp.ne.s32.totalorder %s1010_s10, %s1006_s30  ;;  %p240_p4 = scmp.eq.s32.totalorder %s802_s14, 1 }
   0xa   : > { %s1113_s18 = scalar_select %p221_p1, %s1014_s11, %s223_s16  }
   0xb   : > { %p1115_p5 = por %p234_p2, %p233_p0  ;;  %p1119_p6 = por %p240_p4, %p239_p3 }
   0xc   : > { %p805_p7 = scmp.ge.s32.totalorder %s1018_s12, 1  ;;  %p289_p8 = scmp.lt.s32.totalorder %s1018_s12, 3 }
   0xe   : > { %p290_p9 = pnand %p805_p7, %p289_p8 }
   0xf   : > { %s1256_s21 = sand.u32 (!%p290_p9), 1, %s1010_s10   ;;  %p324_p10 = scmp.lt.s32.totalorder (!%p290_p9), %s1098_s13, 1  ;;  %v808_v0 = vld [vmem:[%s1254_s8] ss:$0 sm:$0xff] (!%p290_p9)  ;;  %vm338_vm0 = vcmask (!%p290_p9), 261120  }
  0x10   : > { %293 = sbr.rel (%p290_p9) target bundleno = 1241 (0x4d9), region = 56  ;;  %s1132_s24 = sshll.u32 (!%p290_p9), %s1256_s21, 3  ;;  %339 = vst.msk [vmem:[#allocation2] sm:$0xff] (!%p290_p9), %vm338_vm0, %v808_v0 }
  0x11   : > { %s1260_s0 = sld [smem:[#allocation6_spill]] (!%p290_p9)  ;;  %s1142_s16 = smov (!%p290_p9), 0  }
  0x17   : > { %s325_s25 = scalar_select %p324_p10, %s1098_s13, 1 }
  0x19   : > { %s807_s26 = sshll.u32 %s325_s25, 3 }
  0x1a   : > { %s327_s29 = scalar_lea.vmem %s1260_s0, %s807_s26 }
  0x1b   : > { %v329_v1 = vld [vmem:[%s327_s29] sm:$0xff] }
  0x1c   : > { %v1139_v2 = vpack.c.bf16 %v329_v1, %v329_v1 }
  0x1d LB: >> { %v1024_v3 = vmov 0.0   ;;  %s833_s17 = sshll.u32 %s1022_s16, 4  ;;  %vm1025_vm1 = vmmov 0   ;;  %s428_s22 = scalar_lea.vmem %s1251_s5, %s1022_s16  ;;  %vm552_vm2 = vcmask 64512   ;;  %vm614_vm3 = vcmask 1043456   ;;  %v658_v55 = vld [vmem:[#allocation2] sm:$0xff]  ;;  %s1022_s16 = sphi %s1142_s16, %s345_s16  }
  0x1e   : >> { %859 = vmatprep.subr.bf16.mxu1 %v1024_v3  ;;  %851 = vmatprep.subr.bf16.mxu0 %v1024_v3  ;;  %s354_s25 = scalar_lea.vmem %s1248_s2, %s833_s17  ;;  %s348_s28 = scalar_lea.vmem %s1247_s1, %s833_s17  ;;  %v817_v8 = vld [vmem:[%s428_s22] ss:$0 sm:$0xff] }
  0x1f   : >> { %863 = vmatprep.mubr.msk.bf16.mxu1 %vm1025_vm1, %v1024_v3  ;;  %855 = vmatprep.mubr.msk.bf16.mxu0 %vm1025_vm1, %v1024_v3  ;;  %v942_v4 = vld [vmem:[%s354_s25] sm:$0xff]   ;;  %v944_v6 = vld [vmem:[%s354_s25 + $0x8] sm:$0xff]   ;;  %s1159_s14 = scalar_lea.vmem %s1249_s3, %s833_s17  ;;  %s365_s26 = scalar_lea.vmem %s1250_s4, %s1022_s16 }
  0x20   : >> { %v943_v5 = vld [vmem:[%s348_s28] sm:$0xff]   ;;  %860 = vmatpush3.bf16.msra.mxu1 %v942_v4  ;;  %v945_v7 = vld [vmem:[%s348_s28 + $0x8] sm:$0xff]   ;;  %s488_s28 = scalar_lea.vmem %s1252_s6, %s1022_s16  ;;  %s827_s29 = sshll.u32 %s1022_s16, 2 }
  0x21   : >> { %861 = vmatprep.subr.bf16.mxu1 %v1024_v3  ;;  %852 = vmatpush3.bf16.msra.mxu0 %v943_v5  ;;  %v813_v9 = vld [vmem:[%s365_s26] ss:$0 sm:$0xff]  ;;  %v947_v25 = vld [vmem:[%s1159_s14 + $0x8] sm:$0xff]   ;;  %s661_s22 = scalar_lea.vmem %s1253_s7, %s827_s29  ;;  %s345_s16 = sadd.s32 1, %s1022_s16  }
  0x22   : >> { %853 = vmatprep.subr.bf16.mxu0 %v1024_v3  ;;  %v946_v24 = vld [vmem:[%s1159_s14] sm:$0xff]   ;;  %p342_p11 = scmp.ge.s32.totalorder %s345_s16, 4  }
  0x23   : >> { %v821_v39 = vld [vmem:[%s488_s28] ss:$0 sm:$0xff]  ;;  %s830_s23 = sshll.u32 (%p342_p11), %s1098_s13, 7  ;;  %s1261_s25 = scalar_lea.vmem (%p342_p11), [#allocation3], %s1132_s24 }
  0x24   : >> { %862 = vmatpush3.bf16.msra.mxu1 %v944_v6  ;;  %v662_v44 = vld [vmem:[%s661_s22] sm:$0xf]  ;;  %s1206_s27 = scalar_lea.hbm (%p342_p11), %s1255_s9, %s830_s23  ;;  %s1262_s28 = smov (%p342_p11), %s1261_s25 }
  0x25   : >> { %854 = vmatpush3.bf16.msra.mxu0 %v945_v7  ;;  %875 = vmatprep.subr.bf16.mxu1 %v1024_v3  ;;  %v667_v45 = vsel %vm614_vm3, %v662_v44, 0  ;;  %s727_s29 = sshll.u32 (%p342_p11), %s1262_s28, 4  ;;  %s1263_s16 = sand.u32 (%p342_p11), 1, %s1010_s10   ;;  %s728_s29 = int_to_ptr.vmem [resolvable:$true] %s727_s29 }
  0x26   : >> { %867 = vmatprep.subr.bf16.mxu0 %v1024_v3  ;;  %s714_s21 = scalar_lea.sflag (%p342_p11), [#allocation4], %s1263_s16  ;;  %s952_s17 = scalar_lea.vmem (%p342_p11), %s728_s29, 128 }
  0x27   : >> { %864 = vmatmul.mubr.msk.bf16.vlgmr.msra.gmra.mrb[0].mxu1 %vm338_vm0, %v1139_v2  ;;  %p953_p12 = scmp.ne.s32.totalorder (%p342_p11), %s728_s29, %s952_s17  ;;  %s1026_s22 = smov (%p342_p11), [#allocation3]  }
  0x28   : >> { %856 = vmatmul.mubr.msk.bf16.vlgmr.msra.gmra.mrb[0].mxu0 %vm338_vm0, %v1139_v2  ;;  %877 = vmatprep.mubr.msk.bf16.mxu1 %vm1025_vm1, %v1024_v3  ;;  %s956_s13 = sshll.u32 (%p342_p11), %s1026_s22, 4  ;;  %s957_s13 = int_to_ptr.vmem [resolvable:$false] %s956_s13 }
  0x29   : >> { %871 = vmatprep.mubr.msk.bf16.mxu0 %vm1025_vm1, %v1024_v3  ;;  %868 = vmatpush3.bf16.msra.mxu0 %v946_v24  ;;  %p954_p13 = pnand (%p342_p11), %p953_p12, %p1115_p5  ;;  %s958_s0 = scalar_lea.vmem (%p342_p11), %s957_s13, 256 }
  0x2a   : >> { %869 = vmatprep.subr.bf16.mxu0 %v1024_v3  ;;  %p959_p1 = scmp.lt.s32.totalorder (%p342_p11), %s728_s29, %s957_s13  ;;  %p960_p2 = scmp.lt.s32.totalorder (%p342_p11), %s958_s0, %s952_s17 }
  0x2b   : > { %p955_p0 = pneg (%p342_p11), %p954_p13 }
  0x2c   : > { %p961_p3 = por (%p342_p11), %p960_p2, %p959_p1 }
  0x2d   : >> { %870 = vmatpush3.bf16.msra.mxu0 %v947_v25 }
  0x2e   : >> { %881 = vmatprep.subr.bf16.mxu0 %v1024_v3  ;;  %p962_p4 = pnand (%p342_p11), %p961_p3, %p955_p0 }
  0x30   : >> { %872 = vmatmul.mubr.msk.bf16.vlgmr.msra.gmra.mrb[4].mxu0 %vm338_vm0, %v1139_v2 }
  0x31   : >> { %883 = vmatprep.mubr.msk.bf16.mxu0 %vm1025_vm1, %v1024_v3 }
  0xfa   : >> { %v482_v10 = vpop.f32.mrb[0].mxu1 }
  0xfb   : >> { %v483_v11 = vadd.f32 %v817_v8, %v482_v10  ;;  %v865_v12 = vpop.f32.mrb[1].mxu1  ;;  %v422_v13 = vpop.f32.mrb[0].mxu0 }
  0xfc   : >> { %v485_v14 = vpop.f32.mrb[2].mxu1  ;;  %v423_v15 = vadd.f32 %v813_v9, %v422_v13  ;;  %v857_v16 = vpop.f32.mrb[1].mxu0 }
  0xfd   : >> { %v550_v17 = vpack.c.bf16 %v483_v11, %v483_v11  ;;  %v866_v18 = vpop.f32.mrb[3].mxu1  ;;  %v425_v19 = vpop.f32.mrb[2].mxu0 }
  0xfe   : >> { %v858_v20 = vpop.f32.mrb[3].mxu0  ;;  %v548_v22 = vmul.f32 0.35355338, %v423_v15 }
  0xff   : >> { %v557_v21 = vsel %vm552_vm2, %v550_v17, 0 }
 0x100   : >> { %876 = vmatpush3.bf16.xpose.msra.mxu1 %v557_v21  ;;  %v549_v23 = vpack.c.bf16 %v548_v22, %v548_v22 }
 0x101   : >> { %887 = vmatprep.subr.bf16.mxu1 %v1024_v3 }
 0x103   : >> { %v542_v36 = vpop.f32.mrb[4].mxu0 }
 0x104   : >> { %v873_v37 = vpop.f32.mrb[5].mxu0  ;;  %v543_v41 = vadd.f32 %v821_v39, %v542_v36 }
 0x105   : >> { %v545_v38 = vpop.f32.mrb[6].mxu0 }
 0x106   : >> { %v874_v40 = vpop.f32.mrb[7].mxu0  ;;  %v551_v42 = vpack.c.bf16 %v543_v41, %v543_v41 }
 0x107   : >> { %878 = vmatmul.mubr.msk.bf16.vlgmr.msra.gmra.mrb[4].mxu1 %vm552_vm2, %v549_v23 }
 0x108   : >> { %889 = vmatprep.mubr.msk.bf16.mxu1 %vm1025_vm1, %v1024_v3  ;;  %v616_v43 = vsel %vm614_vm3, %v551_v42, 0  ;;  %888 = vmatpush3.bf16.msra.mxu1 %v667_v45 }
 0x109   : >> { %882 = vmatpush3.bf16.msra.mxu0 %v616_v43 }
 0x1da   : >> { %v593_v26 = vpop.f32.mrb[4].mxu1 }
 0x1db   : >> { %v879_v27 = vpop.f32.mrb[5].mxu1  ;;  %v599_v28 = vsel %vm552_vm2, %v593_v26, -inf }
 0x1dc   : >> { %600 = vmax.xlane.f32.xlu0 %v599_v28  ;;  %v596_v29 = vpop.f32.mrb[6].mxu1 }
 0x1dd   : >> { %v880_v30 = vpop.f32.mrb[7].mxu1 }
 0x269   : >> { %v601_v31 = vpop.xlane.xlu0 %600 }
 0x26a   : >> { %v602_v32 = vsub.f32 %v593_v26, %v601_v31 }
 0x26c   : >> { %v603_v33 = vmul.f32 1.442695, %v602_v32 }
 0x26e   : >> { %948 = vpow2.f32 %v603_v33 }
 0x278   : >> { %v949_v34 = vpop.eup %948 }
 0x279   : >> { %v605_v35 = vsel %vm552_vm2, %v949_v34, 0.0 }
 0x27a   : >> { %606 = vadd.xlane.f32.xlu0 %v605_v35 }
 0x307   : >> { %v607_v46 = vpop.xlane.xlu0 %606 }
 0x308   : >> { %950 = vrcp.f32 %v607_v46 }
 0x312   : >> { %v951_v47 = vpop.eup %950 }
 0x313   : >> { %v609_v48 = vmul.f32 %v951_v47, %v949_v34 }
 0x315   : >> { %v610_v49 = vpack.c.bf16 %v609_v48, %v609_v48 }
 0x317   : >> { %884 = vmatmul.mubr.msk.bf16.vlgmr.msra.gmra.mrb[8].mxu0 %vm552_vm2, %v610_v49 }
 0x3ea   : >> { %v652_v50 = vpop.f32.mrb[8].mxu0 }
 0x3eb   : >> { %v659_v51 = vpack.c.bf16 %v652_v50, %v652_v50  ;;  %v885_v52 = vpop.f32.mrb[9].mxu0 }
 0x3ec   : >> { %v655_v53 = vpop.f32.mrb[10].mxu0 }
 0x3ed   : >> { %v886_v54 = vpop.f32.mrb[11].mxu0  ;;  %890 = vmatmul.mubr.msk.bf16.vlgmr.msra.gmra.mrb[8].mxu1 %vm552_vm2, %v659_v51 }
 0x4bd   : > { %344 = sbr.rel (!%p342_p11) target bundleno = 29 (0x1d), region = 105 }
 0x4c0   : >> { %v703_v56 = vpop.f32.mrb[8].mxu1 }
 0x4c1   : >> { %v709_v57 = vadd.f32 %v703_v56, %v658_v55  ;;  %v891_v58 = vpop.f32.mrb[9].mxu1 }
 0x4c2   : >> { %v706_v59 = vpop.f32.mrb[10].mxu1 }
 0x4c3   : >> { %710 = vst.msk [vmem:[#allocation2] sm:$0xff] %vm338_vm0, %v709_v57  ;;  %v892_v60 = vpop.f32.mrb[11].mxu1 }
 0x4ca   : > { %v711_v61 = vld [vmem:[#allocation2] sm:$0xff] }
 0x4cb   : > { %712 = vst.msk [vmem:[%s1261_s25] sm:$0xff] %vm338_vm0, %v711_v61 }
 0x4cc   : > { %965 = shalt.err (!%p962_p4)
}
 0x4cd   : > { %s966_s24 = scalar_lea.hbm %s1206_s27, 128  ;;  %s970_s26 = scalar_lea.hbm %s1255_s9, 256 }
 0x4ce   : > { %p967_p7 = scmp.ne.s32.totalorder %s1206_s27, %s966_s24  ;;  %p971_p10 = scmp.lt.u32.totalorder %s1206_s27, %s1255_s9 }
 0x4cf   : > { %p972_p11 = scmp.lt.u32.totalorder %s970_s26, %s966_s24  ;;  %p974_p13 = scmp.lt.u32.totalorder %s966_s24, %s1206_s27 }
 0x4d0   : > { %p968_p8 = pnand %p967_p7, %p1115_p5 }
 0x4d1   : > { %p973_p12 = por %p972_p11, %p971_p10 }
 0x4d2   : > { %p969_p9 = pneg %p968_p8 }
 0x4d3   : > { %p975_p0 = por %p974_p13, %p973_p12 }
 0x4d5   : > { %p976_p1 = pnand %p975_p0, %p969_p9 }
 0x4d7   : > { %979 = shalt.err (!%p976_p1)
}
 0x4d8   : > { %893 = dma.vmem_to_hbm [thread:$0]  (%p1115_p5), %s728_s29, 128, %s1206_s27, %s714_s21  }
 0x4d9 PF: > { %p899_p2 = scmp.ge.s32.totalorder %s1018_s12, 2  ;;  %s739_s0 = sand.u32 1, %s1006_s30  }
 0x4da   : > { %s740_s16 = scalar_lea.sflag [#allocation4], %s739_s0 }
 0x4db   : > { %p896_p3 = pnand %p899_p2, %p1119_p6 }
 0x4dd   : > { %1001 = dma.done.wait (!%p896_p3), %s740_s16, 128  }
 0x4de   : > { %1003 = vsyncadd (!%p896_p3), %s740_s16, 4294967168  ;;  %p19_p4 = scmp.ge.s32.totalorder %s1102_s15, 4   ;;  %s1264_s30 = smov %s1010_s10 }
 0x4df   : > { %s1265_s10 = smov %s1014_s11  ;;  %s1266_s11 = smov %s1113_s18 }
 0x4e0   : > { %s1267_s12 = smov %s1102_s15  ;;  %21 = sbr.rel (!%p19_p4) target bundleno = 5 (0x5), region = 116 }
 0x4e7   :  { %745 = vsyncpa [#allocation4], 1 }
 0x4e8   :  { %747 = vsyncpa [#allocation4 + $0x1], 1 }

</bundles_post_ra>
